<compile_context>
chip_gen: v7x
topology: tpu7x:2x2x1
jax: 0.10.0
libtpu: 0.0.40
codegen_flags: <defaults>
</compile_context>

<pallas_src>
import functools

import jax
import jax.numpy as jnp
from jax.experimental import pallas as pl
from jax.experimental.pallas import tpu as pltpu


def _kd_tile_kernel(s_ref, t_ref, o_ref, *, inv_t, rows_total, block_rows):
    i = pl.program_id(0)

    s_raw = s_ref[...]
    t_raw = t_ref[...]

    # Row max in the wire dtype (packed bf16 vregs stay packed on v6e/v7x),
    # then fold the 1/T scale directly into the shifted value that feeds exp:
    #   softmax(x/T) == exp((x - max(x)) * 1/T) / sum(...)
    t_max = jnp.max(t_raw, axis=1, keepdims=True).astype(jnp.float32)
    t_shift = (t_raw.astype(jnp.float32) - t_max) * inv_t
    t_exp = jnp.exp(t_shift)
    t_denom = jnp.sum(t_exp, axis=1, keepdims=True)             # (TB, 1)

    s_max = jnp.max(s_raw, axis=1, keepdims=True).astype(jnp.float32)
    s_shift = (s_raw.astype(jnp.float32) - s_max) * inv_t
    s_exp = jnp.exp(s_shift)
    s_denom = jnp.sum(s_exp, axis=1, keepdims=True)             # (TB, 1)

    inv_td = pl.reciprocal(t_denom)   # exact (approx=False) to hold 1e-5 tol
    inv_sd = pl.reciprocal(s_denom)

    # Factored per-row KL contributions (tp = teacher softmax, sp = student
    # softmax PROBS — the module feeds probs, not log-probs, into KLDivLoss):
    #   sum_c tp*log(tp) = sum_c(t_exp*t_shift)/t_denom - log(t_denom)
    #   sum_c tp*sp      = sum_c(t_exp*s_exp) / (t_denom*s_denom)
    row_tp_logtp = (jnp.sum(t_exp * t_shift, axis=1, keepdims=True) * inv_td
                    - jnp.log(t_denom))
    row_tp_sp = jnp.sum(t_exp * s_exp, axis=1, keepdims=True) * (inv_td * inv_sd)
    row_contrib = row_tp_logtp - row_tp_sp                      # (TB, 1)

    # Drop padded rows of the last partial batch tile.  jnp.where is a select,
    # so NaN/garbage in the padded rows cannot leak into the sum.
    row_ids = i * block_rows + jax.lax.broadcasted_iota(
        jnp.int32, row_contrib.shape, 0)
    partial = jnp.sum(jnp.where(row_ids < rows_total, row_contrib, 0.0))

    # Lane-dense per-block partial (unmasked vst); summed + scaled in wrapper.
    o_ref[...] = jnp.full(o_ref.shape, partial, dtype=jnp.float32)


def _tpu_vmem_capacity_bytes():
    try:
        return int(pltpu.get_tpu_info().vmem_capacity_bytes)
    except Exception:
        return 64 * 1024 * 1024          # conservative (v7x-sized) fallback


def _pick_block_rows(batch, n_classes, itemsize, vmem_cap):
    # Budget BOTH the DMA double-buffers (2 inputs x 2 buffers x TB x C x wire
    # bytes) AND the ~6 live (TB, C) f32 intermediates the kernel materializes
    # (shift/exp/products for both tensors), so the chosen TB actually fits
    # without spilling.  Leave ~45% of physical VMEM as headroom for the
    # compiler's own scratch, semaphores and the output buffers.
    sublane = {4: 8, 2: 16, 1: 32}.get(itemsize, 8)
    budget = int(vmem_cap * 0.55)
    per_row = n_classes * (4 * itemsize + 6 * 4)
    tb = max(sublane, budget // max(per_row, 1))
    tb = int(min(tb, batch, 4096))
    if tb >= sublane:
        tb -= tb % sublane               # dtype-aware sublane rounding
    return max(1, tb)


def kd_loss(student_logits, teacher_logits, temperature=1.0, block_rows=None):
    assert student_logits.shape == teacher_logits.shape
    B, C = student_logits.shape
    itemsize = max(jnp.dtype(student_logits.dtype).itemsize,
                   jnp.dtype(teacher_logits.dtype).itemsize)

    vmem_cap = _tpu_vmem_capacity_bytes()
    if block_rows is None:
        block_rows = _pick_block_rows(B, C, itemsize, vmem_cap)
    block_rows = min(block_rows, B)
    num_blocks = pl.cdiv(B, block_rows)

    T = float(temperature)
    scale = (T * T) / float(B * C)   # KLDivLoss 'mean' (= sum/numel) times T^2

    kernel = functools.partial(
        _kd_tile_kernel, inv_t=1.0 / T, rows_total=B, block_rows=block_rows)

    cost = pl.CostEstimate(
        flops=10 * B * C,
        transcendentals=2 * B * C,
        bytes_accessed=2 * B * C * itemsize + num_blocks * 128 * 4,
    )

    partials = pl.pallas_call(
        kernel,
        out_shape=jax.ShapeDtypeStruct((num_blocks, 1, 128), jnp.float32),
        grid=(num_blocks,),
        in_specs=[
            pl.BlockSpec((block_rows, C), lambda i: (i, 0)),
            pl.BlockSpec((block_rows, C), lambda i: (i, 0)),
        ],
        out_specs=pl.BlockSpec((1, 1, 128), lambda i: (i, 0, 0)),
        compiler_params=pltpu.CompilerParams(
            # Per-block partials -> batch axis is fully parallel, so the grid
            # can shard across both TensorCores on v7x (neutral on 1-TC parts).
            dimension_semantics=("parallel",),
            vmem_limit_bytes=int(vmem_cap * 0.8),
        ),
        cost_estimate=cost,
    )(student_logits, teacher_logits)

    return jnp.sum(partials[:, 0, 0]) * scale


def _kd_loss_ref(student_logits, teacher_logits, temperature=1.0):
    # Pure-JAX reference mirroring the PyTorch module semantics exactly.
    T = float(temperature)
    sp = jax.nn.softmax(student_logits.astype(jnp.float32) / T, axis=1)
    tp = jax.nn.softmax(teacher_logits.astype(jnp.float32) / T, axis=1)
    pointwise = tp * (jnp.log(tp) - sp)
    return jnp.mean(pointwise) * (T ** 2)


if __name__ == "__main__":
    key = jax.random.PRNGKey(0)
    k1, k2 = jax.random.split(key)

    # Test 1: small shape consistent with the module (batch=8, classes=128), f32.
    B, C = 8, 128
    s = jax.random.normal(k1, (B, C), dtype=jnp.float32)
    t = jax.random.normal(k2, (B, C), dtype=jnp.float32)
    loss = kd_loss(s, t, temperature=2.0)
    jax.block_until_ready(loss)
    ref = _kd_loss_ref(s, t, temperature=2.0)
    assert jnp.allclose(loss, ref, rtol=1e-5, atol=1e-5), (loss, ref)

    # Test 2: batch not divisible by the row tile (multi-block grid + masking,
    # parallel partials summed in the wrapper).
    k3, k4 = jax.random.split(k2)
    s2 = jax.random.normal(k3, (20, 256), dtype=jnp.float32)
    t2 = jax.random.normal(k4, (20, 256), dtype=jnp.float32)
    loss2 = kd_loss(s2, t2, temperature=3.0, block_rows=16)
    jax.block_until_ready(loss2)
    ref2 = _kd_loss_ref(s2, t2, temperature=3.0)
    assert jnp.allclose(loss2, ref2, rtol=1e-5, atol=1e-5), (loss2, ref2)

    # Test 3: bf16 logits on the wire (half the HBM bytes); kernel upcasts inside.
    s3 = jax.random.normal(k1, (16, 128), dtype=jnp.float32).astype(jnp.bfloat16)
    t3 = jax.random.normal(k4, (16, 128), dtype=jnp.float32).astype(jnp.bfloat16)
    loss3 = kd_loss(s3, t3, temperature=1.0)
    jax.block_until_ready(loss3)
    ref3 = _kd_loss_ref(s3, t3, temperature=1.0)
    assert jnp.allclose(loss3, ref3, rtol=1e-5, atol=1e-5), (loss3, ref3)

    print("KERNEL_OK")
</pallas_src>

<mosaic_0001>
module attributes {stable_mosaic.version = 11 : i64} {
  func.func @_kd_tile_kernel(%arg0: i32, %arg1: memref<8x128xf32, #tpu.memory_space<vmem>>, %arg2: memref<8x128xf32, #tpu.memory_space<vmem>>, %arg3: memref<1x1x128xf32, #tpu.memory_space<vmem>>) attributes {dimension_semantics = [#tpu.dimension_semantics<parallel>], iteration_bounds = array<i64: 1>, scalar_prefetch = 0 : i64, scratch_operands = 0 : i64, tpu.core_type = #tpu.core_type<tc>, window_params = [{transform_indices = @transform_0, window_bounds = array<i64: 8, 128>}, {transform_indices = @transform_1, window_bounds = array<i64: 8, 128>}, {transform_indices = @transform_2, window_bounds = array<i64: 1, 1, 128>}]} {
    %c0 = arith.constant 0 : index
    %c0_0 = arith.constant 0 : index
    %0 = vector.load %arg1[%c0, %c0_0] : memref<8x128xf32, #tpu.memory_space<vmem>>, vector<8x128xf32>
    %c0_1 = arith.constant 0 : index
    %c0_2 = arith.constant 0 : index
    %1 = vector.load %arg2[%c0_1, %c0_2] : memref<8x128xf32, #tpu.memory_space<vmem>>, vector<8x128xf32>
    %cst = arith.constant dense<0xFF800000> : vector<8xf32>
    %2 = vector.multi_reduction <maximumf>, %1, %cst [1] : vector<8x128xf32> to vector<8xf32>
    %3 = vector.shape_cast %2 : vector<8xf32> to vector<8x1xf32>
    %4 = vector.broadcast %3 : vector<8x1xf32> to vector<8x128xf32>
    %5 = arith.subf %1, %4 : vector<8x128xf32>
    %cst_3 = arith.constant 5.000000e-01 : f32
    %6 = vector.broadcast %cst_3 : f32 to vector<8x128xf32>
    %7 = arith.mulf %5, %6 : vector<8x128xf32>
    %8 = math.exp %7 : vector<8x128xf32>
    %cst_4 = arith.constant dense<0.000000e+00> : vector<8xf32>
    %9 = vector.multi_reduction <add>, %8, %cst_4 [1] : vector<8x128xf32> to vector<8xf32>
    %10 = vector.shape_cast %9 : vector<8xf32> to vector<8x1xf32>
    %cst_5 = arith.constant dense<0xFF800000> : vector<8xf32>
    %11 = vector.multi_reduction <maximumf>, %0, %cst_5 [1] : vector<8x128xf32> to vector<8xf32>
    %12 = vector.shape_cast %11 : vector<8xf32> to vector<8x1xf32>
    %13 = vector.broadcast %12 : vector<8x1xf32> to vector<8x128xf32>
    %14 = arith.subf %0, %13 : vector<8x128xf32>
    %cst_6 = arith.constant 5.000000e-01 : f32
    %15 = vector.broadcast %cst_6 : f32 to vector<8x128xf32>
    %16 = arith.mulf %14, %15 : vector<8x128xf32>
    %17 = math.exp %16 : vector<8x128xf32>
    %cst_7 = arith.constant dense<0.000000e+00> : vector<8xf32>
    %18 = vector.multi_reduction <add>, %17, %cst_7 [1] : vector<8x128xf32> to vector<8xf32>
    %19 = vector.shape_cast %18 : vector<8xf32> to vector<8x1xf32>
    %20 = tpu.reciprocal %10 : vector<8x1xf32> -> vector<8x1xf32>
    %21 = tpu.reciprocal %19 : vector<8x1xf32> -> vector<8x1xf32>
    %22 = arith.mulf %8, %7 : vector<8x128xf32>
    %cst_8 = arith.constant dense<0.000000e+00> : vector<8xf32>
    %23 = vector.multi_reduction <add>, %22, %cst_8 [1] : vector<8x128xf32> to vector<8xf32>
    %24 = vector.shape_cast %23 : vector<8xf32> to vector<8x1xf32>
    %25 = arith.mulf %24, %20 : vector<8x1xf32>
    %26 = math.log %10 : vector<8x1xf32>
    %27 = arith.subf %25, %26 : vector<8x1xf32>
    %28 = arith.mulf %8, %17 : vector<8x128xf32>
    %cst_9 = arith.constant dense<0.000000e+00> : vector<8xf32>
    %29 = vector.multi_reduction <add>, %28, %cst_9 [1] : vector<8x128xf32> to vector<8xf32>
    %30 = vector.shape_cast %29 : vector<8xf32> to vector<8x1xf32>
    %31 = arith.mulf %20, %21 : vector<8x1xf32>
    %32 = arith.mulf %30, %31 : vector<8x1xf32>
    %33 = arith.subf %27, %32 : vector<8x1xf32>
    %c8_i32 = arith.constant 8 : i32
    %34 = arith.muli %arg0, %c8_i32 : i32
    %35 = tpu.iota {dimensions = array<i32: 0>} : vector<8x1xi32>
    %36 = vector.broadcast %34 : i32 to vector<8x1xi32>
    %37 = arith.addi %36, %35 : vector<8x1xi32>
    %c8_i32_10 = arith.constant 8 : i32
    %38 = vector.broadcast %c8_i32_10 : i32 to vector<8x1xi32>
    %39 = arith.cmpi slt, %37, %38 : vector<8x1xi32>
    %cst_11 = arith.constant 0.000000e+00 : f32
    %40 = vector.broadcast %cst_11 : f32 to vector<8x1xf32>
    %41 = arith.select %39, %33, %40 : vector<8x1xi1>, vector<8x1xf32>
    %42 = vector.shape_cast %41 : vector<8x1xf32> to vector<1x8x1xf32>
    %cst_12 = arith.constant dense<0.000000e+00> : vector<1xf32>
    %43 = vector.multi_reduction <add>, %42, %cst_12 [1, 2] : vector<1x8x1xf32> to vector<1xf32>
    %44 = vector.shape_cast %43 : vector<1xf32> to vector<1x1x1xf32>
    %45 = vector.extract %44[0, 0, 0] : f32 from vector<1x1x1xf32>
    %46 = vector.broadcast %45 : f32 to vector<1x1x128xf32>
    %c0_13 = arith.constant 0 : index
    %c0_14 = arith.constant 0 : index
    %c0_15 = arith.constant 0 : index
    %47 = vector.load %arg3[%c0_13, %c0_14, %c0_15] : memref<1x1x128xf32, #tpu.memory_space<vmem>>, vector<1x1x128xf32>
    tpu.vector_store %arg3[%c0_13, %c0_14, %c0_15], %46 {strides = array<i32>} : memref<1x1x128xf32, #tpu.memory_space<vmem>>, vector<1x1x128xf32>,
    return
  }
  func.func @transform_0(%arg0: i32) -> (i32, i32) {
    %c0_i32 = arith.constant 0 : i32
    %c0_i32_0 = arith.constant 0 : i32
    return %arg0, %c0_i32 : i32, i32
  }
  func.func @transform_1(%arg0: i32) -> (i32, i32) {
    %c0_i32 = arith.constant 0 : i32
    %c0_i32_0 = arith.constant 0 : i32
    return %arg0, %c0_i32 : i32, i32
  }
  func.func @transform_2(%arg0: i32) -> (i32, i32, i32) {
    %c0_i32 = arith.constant 0 : i32
    %c0_i32_0 = arith.constant 0 : i32
    %c0_i32_1 = arith.constant 0 : i32
    return %arg0, %c0_i32, %c0_i32_0 : i32, i32, i32
  }
}

</mosaic_0001>

<bundles_post_ra>
// kernel: tpu_custom_call.1
= control target key start
LH: loop header
LB: loop body
LE: loop exit
PB: predicated region body
PF: predicated region fallthrough
CT: control target
= control target key end

     0   :  { %7 = vsyncpa [#allocation3], 0  ;;  %s246_s0 = inlined_call_operand.hbm [shape: f32[8,128], index: 0, kind: input, shape index: {}]   ;;  %s247_s1 = inlined_call_operand.hbm [shape: f32[8,128], index: 1, kind: input, shape index: {}]   ;;  %s248_s2 = inlined_call_operand.hbm [shape: f32[1,1,128], index: 2, kind: output, shape index: {}]  }
   0x1   :  { %8 = vsyncpa [#allocation6], 0 }
   0x2   :  { %9 = vsyncpa [#allocation4], 0  ;;  %s192_s9 = smov [#allocation2]   ;;  %s193_s11 = smov [#allocation5]  }
   0x3   :  { %s16_s10 = sshll.u32 %s192_s9, 4  ;;  %s26_s12 = sshll.u32 %s193_s11, 4  ;;  %s17_s10 = int_to_ptr.vmem [resolvable:$true] %s16_s10  ;;  %s27_s12 = int_to_ptr.vmem [resolvable:$true] %s26_s12 }
   0x4   :  { %s120_s15 = scalar_lea.hbm %s246_s0, 128 }
   0x5   :  { %p121_p0 = scmp.ne.s32.totalorder %s246_s0, %s120_s15  ;;  %p124_p1 = scmp.lt.u32.totalorder %s120_s15, %s246_s0 }
   0x7   :  { %p126_p2 = pnand %p124_p1, %p121_p0 }
   0x9   :  { %129 = shalt.err (!%p126_p2)
}
   0xa   :  { %s130_s20 = scalar_lea.vmem %s17_s10, 128  ;;  %p135_p4 = scmp.lt.s32.totalorder %s17_s10, %s17_s10 }
   0xb   :  { %p131_p3 = scmp.ne.s32.totalorder %s17_s10, %s130_s20  ;;  %p136_p5 = scmp.lt.s32.totalorder %s130_s20, %s130_s20 }
   0xd   :  { %p137_p6 = por %p136_p5, %p135_p4 }
   0xf   :  { %p138_p7 = pnand %p137_p6, %p131_p3 }
  0x11   :  { %141 = shalt.err (!%p138_p7)
}
  0x12   :  { %19 = dma.hbm_to_vmem [thread:$0]  %s246_s0, 128, %s17_s10, [#allocation3]  }
  0x13   :  { %s142_s25 = scalar_lea.hbm %s247_s1, 128 }
  0x14   :  { %p143_p8 = scmp.ne.s32.totalorder %s247_s1, %s142_s25  ;;  %p146_p9 = scmp.lt.u32.totalorder %s142_s25, %s247_s1 }
  0x16   :  { %p148_p10 = pnand %p146_p9, %p143_p8 }
  0x18   :  { %151 = shalt.err (!%p148_p10)
}
  0x19   :  { %s152_s30 = scalar_lea.vmem %s27_s12, 128  ;;  %p157_p12 = scmp.lt.s32.totalorder %s27_s12, %s27_s12 }
  0x1a   :  { %p153_p11 = scmp.ne.s32.totalorder %s27_s12, %s152_s30  ;;  %p158_p13 = scmp.lt.s32.totalorder %s152_s30, %s152_s30 }
  0x1c   :  { %p159_p0 = por %p158_p13, %p157_p12 }
  0x1e   :  { %p160_p1 = pnand %p159_p0, %p153_p11 }
  0x20   :  { %163 = shalt.err (!%p160_p1)
}
  0x21   :  { %29 = dma.hbm_to_vmem [thread:$0]  %s247_s1, 128, %s27_s12, [#allocation6]  }
  0x22   :  { %186 = dma.done.wait [#allocation3], 128  }
  0x23   :  { %187 = vsyncadd [#allocation3], 4294967168 }
  0x24   :  { %188 = dma.done.wait [#allocation6], 128  }
  0x25   :  { %189 = vsyncadd [#allocation6], 4294967168  ;;  %v37_v0 = vld [vmem:[#allocation5] sm:$0xff]  ;;  %v36_v1 = vld [vmem:[#allocation2] sm:$0xff]  ;;  %vm76_vm0 = vcmask 7168   ;;  %s194_s1 = smov [#allocation7]  }
  0x26   :  { %38 = vmax.xlane.f32.xlu0 %v37_v0  ;;  %s95_s4 = sshll.u32 %s194_s1, 4  ;;  %s96_s4 = int_to_ptr.vmem [resolvable:$true] %s95_s4 }
  0x27   :  { %s164_s6 = scalar_lea.vmem %s96_s4, 16  ;;  %s168_s7 = scalar_lea.vmem %s96_s4, 32 }
  0x28   :  { %p165_p2 = scmp.ne.s32.totalorder %s96_s4, %s164_s6  ;;  %p169_p3 = scmp.lt.s32.totalorder %s96_s4, %s96_s4 }
  0x29   :  { %p170_p4 = scmp.lt.s32.totalorder %s168_s7, %s164_s6 }
  0x2a   :  { %46 = vmax.xlane.f32.xlu0 %v36_v1 }
  0x2b   :  { %p171_p5 = por %p170_p4, %p169_p3 }
  0x2d   :  { %p172_p6 = pnand %p171_p5, %p165_p2 }
  0xb3   :  { %v39_v2 = vpop.xlane.xlu0 %38 }
  0xb4   :  { %v40_v3 = vsub.f32 %v37_v0, %v39_v2 }
  0xb6   :  { %v41_v4 = vmul.f32 0.5, %v40_v3 }
  0xb7   :  { %v47_v5 = vpop.xlane.xlu0 %46 }
  0xb8   :  { %v42_v6 = vmul.f32 1.442695, %v41_v4  ;;  %v48_v7 = vsub.f32 %v36_v1, %v47_v5 }
  0xba   :  { %110 = vpow2.f32 %v42_v6  ;;  %v49_v8 = vmul.f32 0.5, %v48_v7 }
  0xbc   :  { %v50_v9 = vmul.f32 1.442695, %v49_v8 }
  0xbe   :  { %112 = vpow2.f32 %v50_v9 }
  0xc4   :  { %v111_v10 = vpop.eup %110 }
  0xc5   :  { %44 = vadd.xlane.f32.xlu1 %v111_v10  ;;  %v56_v11 = vmul.f32 %v111_v10, %v41_v4 }
  0xc7   :  { %57 = vadd.xlane.f32.xlu0 %v56_v11 }
  0xc8   :  { %v113_v12 = vpop.eup %112 }
  0xc9   :  { %52 = vadd.xlane.f32.xlu1 %v113_v12  ;;  %v63_v13 = vmul.f32 %v113_v12, %v111_v10 }
  0xcd   :  { %64 = vadd.xlane.f32.xlu1 %v63_v13 }
 0x152   :  { %v45_v14 = vpop.xlane.xlu1 %44 }
 0x153   :  { %114 = vrcp.f32 %v45_v14 }
 0x154   :  { %116 = vlog2.f32 %v45_v14  ;;  %v58_v18 = vpop.xlane.xlu0 %57 }
 0x156   :  { %v53_v15 = vpop.xlane.xlu1 %52 }
 0x157   :  { %118 = vrcp.f32 %v53_v15 }
 0x15a   :  { %v65_v23 = vpop.xlane.xlu1 %64 }
 0x15d   :  { %v115_v16 = vpop.eup %114 }
 0x15e   :  { %v117_v17 = vpop.eup %116  ;;  %v59_v20 = vmul.f32 %v115_v16, %v58_v18 }
 0x15f   :  { %v61_v19 = vmul.f32 0.6931472, %v117_v17 }
 0x161   :  { %v119_v21 = vpop.eup %118  ;;  %v62_v24 = vsub.f32 %v59_v20, %v61_v19 }
 0x162   :  { %v66_v22 = vmul.f32 %v119_v21, %v115_v16 }
 0x164   :  { %v67_v25 = vmul.f32 %v66_v22, %v65_v23 }
 0x166   :  { %v68_v26 = vsub.f32 %v62_v24, %v67_v25 }
 0x168   :  { %v77_v27 = vsel %vm76_vm0, %v68_v26, 0.0 }
 0x169   :  { %78 = vadd.xlane.f32.xlu0 %v77_v27 }
 0x1f6   :  { %v79_v28 = vpop.xlane.xlu0 %78 }
 0x1f7   :  { %v80_v29 = vrot.slane %v79_v28, 4 }
 0x1f9   :  { %v81_v30 = vadd.f32 %v80_v29, %v79_v28 }
 0x1fb   :  { %v82_v31 = vrot.slane %v81_v30, 2 }
 0x1fd   :  { %v83_v32 = vadd.f32 %v82_v31, %v81_v30 }
 0x1ff   :  { %v84_v33 = vrot.slane %v83_v32, 1 }
 0x201   :  { %v85_v34 = vadd.f32 %v84_v33, %v83_v32 }
 0x203   :  { %105 = vpush %v85_v34 }
 0x234   :  { %s106_s5 = spop %105 }
 0x235   :  { %v87_v35 = vstv %s106_s5 }
 0x236   :  { %88 = vst [vmem:[#allocation7] sm:$0x1] %v87_v35 }
 0x237   :  { %175 = shalt.err (!%p172_p6)
}
 0x238   :  { %s176_s10 = scalar_lea.hbm %s248_s2, 16 }
 0x239   :  { %p177_p7 = scmp.ne.s32.totalorder %s248_s2, %s176_s10  ;;  %p180_p8 = scmp.lt.u32.totalorder %s176_s10, %s248_s2 }
 0x23b   :  { %p182_p9 = pnand %p180_p8, %p177_p7 }
 0x23d   :  { %185 = shalt.err (!%p182_p9)
}
 0x23e   :  { %98 = dma.vmem_to_hbm [thread:$0]  %s96_s4, 16, %s248_s2, [#allocation4]  }
 0x23f   :  { %190 = dma.done.wait [#allocation4], 16  }
 0x240   :  { %191 = vsyncadd [#allocation4], 4294967280 }
 0x241   :  { %102 = vsyncpa [#allocation3], 1 }
 0x242   :  { %103 = vsyncpa [#allocation6], 1 }
 0x243   :  { %104 = vsyncpa [#allocation4], 1 }

</bundles_post_ra>
